<compile_context>
chip_gen: v6e
topology: v6e:2x2x1
jax: 0.10.0
libtpu: 0.0.40
codegen_flags: <defaults>
</compile_context>

<pallas_src>
import jax
import jax.numpy as jnp
import numpy as np
from jax.experimental import pallas as pl
from jax.experimental.pallas import tpu as pltpu

LANE = 128           # lane width: K and N are padded to multiples of this
MAX_OUT_ELEMS = 32768  # cap TM*TN so the live f32 output tile stays <= 32 vregs


def _round_up(x, m):
    return (x + m - 1) // m * m


def _pad_to(a, axis, size):
    pad = [(0, 0)] * a.ndim
    pad[axis] = (0, size - a.shape[axis])
    return jnp.pad(a, pad)


# ------------------------------------------------------------------ kernel ---
def _make_mm_kernel(has_residual, relu):
    """One fused tile: (TM,Kp)bf16 @ (Kp,TN)bf16 -> f32, + BN offset
    (+ residual) (+ ReLU), store lane-dense."""
    def kernel(*refs):
        if has_residual:
            p_ref, w_ref, off_ref, res_ref, o_ref = refs
        else:
            p_ref, w_ref, off_ref, o_ref = refs
        acc = jnp.dot(p_ref[...], w_ref[...],
                      preferred_element_type=jnp.float32)
        acc = acc + off_ref[...]                 # (1, TN) broadcast
        if has_residual:
            acc = acc + res_ref[...]
        if relu:
            acc = jnp.maximum(acc, 0.0)
        o_ref[...] = acc.astype(o_ref.dtype)
    return kernel


# ----------------------------------------------------------------- wrapper ---
def fused_matmul(patches, w, offset, *, residual=None, relu, out_dtype):
    """Tap-packed conv as a tiled matmul with fused BN/residual/ReLU epilogue.

    patches : (M, K_true)   im2col rows (any float dtype; cast to bf16)
    w       : (Kp, Np)      BN-folded weights, Kp/Np multiples of 128, bf16
    offset  : (Np,)         folded BN offset / bias, f32
    residual: optional (M, Np) f32, added pre-ReLU
    returns (Mp, Np) in out_dtype, rows >= M are padding.
    """
    M, K = patches.shape
    Kp, Np = w.shape
    assert K <= Kp and Np % LANE == 0
    Mp = _round_up(M, LANE)

    TN = 256 if Np % 256 == 0 else 128
    tm_cap = MAX_OUT_ELEMS // TN
    TM = tm_cap if Mp % tm_cap == 0 else 128     # LANE-padded Mp => 128 always divides

    p_pad = jnp.pad(patches.astype(jnp.bfloat16), ((0, Mp - M), (0, Kp - K)))
    args = [p_pad, w.astype(jnp.bfloat16), offset.reshape(1, Np).astype(jnp.float32)]
    in_specs = [
        pl.BlockSpec((TM, Kp), lambda i, j: (i, 0)),
        pl.BlockSpec((Kp, TN), lambda i, j: (0, j)),
        pl.BlockSpec((1, TN), lambda i, j: (0, j)),
    ]
    if residual is not None:
        assert residual.shape == (M, Np)
        args.append(jnp.pad(residual.astype(jnp.float32), ((0, Mp - M), (0, 0))))
        in_specs.append(pl.BlockSpec((TM, TN), lambda i, j: (i, j)))

    flops = 2 * Mp * Kp * Np
    bytes_accessed = (2 * (Mp * Kp + Kp * Np) + 4 * Np
                      + 4 * Mp * Np * (2 if residual is not None else 1))

    out = pl.pallas_call(
        _make_mm_kernel(residual is not None, relu),
        out_shape=jax.ShapeDtypeStruct((Mp, Np), out_dtype),
        grid=(Mp // TM, Np // TN),
        in_specs=in_specs,
        out_specs=pl.BlockSpec((TM, TN), lambda i, j: (i, j)),
        compiler_params=pltpu.CompilerParams(
            dimension_semantics=("parallel", "parallel")),
        cost_estimate=pl.CostEstimate(flops=flops, transcendentals=0,
                                      bytes_accessed=bytes_accessed),
    )(*args)
    return out


# ------------------------------------------------------------------ im2col ---
def _im2col_3x3(x, pads, stride):
    """x: (B,H,W,C) -> (B,Ho,Wo,9*C), taps ordered dy-major/dx-minor, then C."""
    B, H, W, C = x.shape
    pt, pb, plft, prgt = pads
    xp = jnp.pad(x, ((0, 0), (pt, pb), (plft, prgt), (0, 0)))
    Hp, Wp = H + pt + pb, W + plft + prgt
    Ho = (Hp - 3) // stride + 1
    Wo = (Wp - 3) // stride + 1
    taps = [xp[:, dy:dy + (Ho - 1) * stride + 1:stride,
               dx:dx + (Wo - 1) * stride + 1:stride, :]
            for dy in range(3) for dx in range(3)]
    return jnp.concatenate(taps, axis=-1), Ho, Wo


# ------------------------------------------------------ parameter folding ---
def bn_fold(gamma, beta, mean, var, conv_bias=None, eps=1e-5):
    s = gamma / jnp.sqrt(var + eps)
    b = jnp.zeros_like(gamma) if conv_bias is None else conv_bias
    return s, (b - mean) * s + beta


def _prep_params(p, in_planes, planes, need_shortcut):
    """Fold BN into tap-packed (9*Cin, Cout) bf16 weight matrices, and collapse
    the whole AA_Group shortcut (densePool + grouped 1x1 + aggregate 1x1 + BN)
    into one 9-tap stride-2 conv."""
    Cmid_p = _round_up(planes, LANE)
    Cout_p = _round_up(planes, LANE)
    K1p = _round_up(9 * in_planes, LANE)
    K2p = _round_up(9 * planes, LANE)

    def pack(w_oihw, scale, cin, cout, kp, cp):
        # (O,I,3,3) -> (ky,kx,I,O) -> (9*I, O): tap-major, channel-minor (im2col order)
        t = jnp.transpose(w_oihw, (2, 3, 1, 0)).reshape(9 * cin, cout) * scale[None, :]
        return jnp.pad(t, ((0, kp - 9 * cin), (0, cp - cout))).astype(jnp.bfloat16)

    s1, o1 = bn_fold(*p['bn1'])
    s2, o2 = bn_fold(*p['bn2'])
    prep = {
        'w1': pack(p['w1'], s1, in_planes, planes, K1p, Cmid_p),
        'o1': _pad_to(o1, 0, Cmid_p).astype(jnp.float32),
        'w2': pack(p['w2'], s2, planes, planes, K2p, Cout_p),
        'o2': _pad_to(o2, 0, Cout_p).astype(jnp.float32),
    }
    if need_shortcut:
        ceil_ch = p['w_group'].shape[0]
        cpg = ceil_ch // in_planes
        wg = p['w_group'][:, :, 0, 0].reshape(in_planes, cpg, 4)      # (g, q, k)
        wa_flat = p['w_agg'][:, :, 0, 0]                              # (o, ceil)
        wa = wa_flat.reshape(planes, in_planes, cpg)                  # (o, g, q)
        # grouped 1x1 followed by 1x1 aggregate == one matmul per densePool channel
        w_eff = jnp.einsum('ogq,gqk->ogk', wa, wg)                    # (o, c, 4)
        b_eff = wa_flat @ p['b_group'] + p['b_agg']
        s_sc, o_sc = bn_fold(*p['bn_sc'], conv_bias=b_eff)
        w_eff = w_eff * s_sc[:, None, None]

        # densePool(2, stride 2) is linear: its four shifted 2x2 averages fold
        # into 3x3 stride-2 tap weights (zero pad only on bottom/right).
        def kset(d):
            return (0,) if d == 0 else ((1,) if d == 2 else (0, 1))

        taps = []
        for dy in range(3):
            for dx in range(3):
                acc = None
                for ky in kset(dy):
                    for kx in kset(dx):
                        term = w_eff[:, :, 2 * ky + kx]
                        acc = term if acc is None else acc + term
                taps.append(0.25 * acc.T)                             # (cin, cout)
        w_sc = jnp.stack(taps, axis=0).reshape(9 * in_planes, planes)  # tap-major
        prep['w_sc'] = jnp.pad(w_sc, ((0, K1p - 9 * in_planes),
                                      (0, Cout_p - planes))).astype(jnp.bfloat16)
        prep['o_sc'] = _pad_to(o_sc, 0, Cout_p).astype(jnp.float32)
    return prep, (Cmid_p, Cout_p)


# ------------------------------------------------------------- BasicBlock ---
def basic_block_forward(x, p, in_planes, planes, stride):
    B, Cin, H, W = x.shape
    assert Cin == in_planes
    need_shortcut = (stride != 1) or (in_planes != planes)
    prep, (Cmid_p, Cout_p) = _prep_params(p, in_planes, planes, need_shortcut)

    xh = jnp.transpose(x, (0, 2, 3, 1)).astype(jnp.float32)   # NHWC, true channels

    # conv1 + BN1 + ReLU (intermediate kept in bf16: it is a bf16 MXU operand next)
    p1, Ho, Wo = _im2col_3x3(xh, (1, 1, 1, 1), stride)
    M = B * Ho * Wo
    h1 = fused_matmul(p1.reshape(M, 9 * in_planes), prep['w1'], prep['o1'],
                      relu=True, out_dtype=jnp.bfloat16)      # (Mp, Cmid_p)

    # shortcut: AA_Group folded into one 9-tap stride-2 conv; identity otherwise
    if need_shortcut:
        psc, Hs, Ws = _im2col_3x3(xh, (0, 2, 0, 2), 2)
        assert (Hs, Ws) == (Ho, Wo)
        sc = fused_matmul(psc.reshape(M, 9 * in_planes), prep['w_sc'], prep['o_sc'],
                          relu=False, out_dtype=jnp.float32)[:M]      # (M, Cout_p)
    else:
        sc = _pad_to(xh.reshape(M, in_planes), 1, Cout_p)             # (M, Cout_p)

    # conv2 + BN2 + residual add + ReLU, all in one fused epilogue
    h1_img = h1[:M, :planes].reshape(B, Ho, Wo, planes)
    p2, Ho2, Wo2 = _im2col_3x3(h1_img, (1, 1, 1, 1), 1)
    assert (Ho2, Wo2) == (Ho, Wo)
    out = fused_matmul(p2.reshape(M, 9 * planes), prep['w2'], prep['o2'],
                       residual=sc, relu=True, out_dtype=jnp.float32)
    out = out[:M, :planes].reshape(B, Ho, Wo, planes)
    return jnp.transpose(out, (0, 3, 1, 2))


# ------------------------------------------------------------------ params ---
def init_params(key, in_planes, planes):
    ceil_channel = planes // in_planes * in_planes
    if planes % in_planes != 0:
        ceil_channel += in_planes
    keys = iter(jax.random.split(key, 24))

    def normal(shape, scale=0.1):
        return scale * jax.random.normal(next(keys), shape, dtype=jnp.float32)

    def bn_params(c):
        gamma = 1.0 + 0.1 * jax.random.normal(next(keys), (c,), dtype=jnp.float32)
        beta = 0.1 * jax.random.normal(next(keys), (c,), dtype=jnp.float32)
        mean = 0.1 * jax.random.normal(next(keys), (c,), dtype=jnp.float32)
        var = jax.random.uniform(next(keys), (c,), dtype=jnp.float32,
                                 minval=0.5, maxval=1.5)
        return (gamma, beta, mean, var)

    return {
        'w1': normal((planes, in_planes, 3, 3)),
        'bn1': bn_params(planes),
        'w2': normal((planes, planes, 3, 3)),
        'bn2': bn_params(planes),
        # AA_Group shortcut (kernel_size=1): grouped conv + 1x1 aggregate
        'w_group': normal((ceil_channel, 4, 1, 1)),
        'b_group': normal((ceil_channel,)),
        'w_agg': normal((planes, ceil_channel, 1, 1)),
        'b_agg': normal((planes,)),
        'bn_sc': bn_params(planes),
    }


# ------------------------------------------------------ pure-JAX reference ---
def basic_block_reference(x, p, in_planes, planes, stride, eps=1e-5):
    hp = jax.lax.Precision.HIGHEST

    def conv(x, w, stride, padding, groups=1, bias=None):
        out = jax.lax.conv_general_dilated(
            x, w, (stride, stride), ((padding, padding), (padding, padding)),
            dimension_numbers=('NCHW', 'OIHW', 'NCHW'),
            feature_group_count=groups, precision=hp)
        if bias is not None:
            out = out + bias[None, :, None, None]
        return out

    def bn(x, prm):
        g, b, m, v = prm
        return ((x - m[None, :, None, None]) / jnp.sqrt(v + eps)[None, :, None, None]
                * g[None, :, None, None] + b[None, :, None, None])

    def avgpool2(x):
        B, C, H, W = x.shape
        return x.reshape(B, C, H // 2, 2, W // 2, 2).mean(axis=(3, 5))

    def dense_pool_ref(x):
        B, C, H, W = x.shape
        x0 = avgpool2(x)
        xr = avgpool2(jnp.pad(x, ((0, 0), (0, 0), (0, 0), (0, 1)))[:, :, :, 1:])
        xd = avgpool2(jnp.pad(x, ((0, 0), (0, 0), (0, 1), (0, 0)))[:, :, 1:, :])
        xrd = avgpool2(jnp.pad(x, ((0, 0), (0, 0), (0, 1), (0, 1)))[:, :, 1:, 1:])
        Ho, Wo = x0.shape[2], x0.shape[3]
        return jnp.stack((x0, xr, xd, xrd), axis=2).reshape(B, C * 4, Ho, Wo)

    out = jax.nn.relu(bn(conv(x, p['w1'], stride, 1), p['bn1']))
    out = bn(conv(out, p['w2'], 1, 1), p['bn2'])
    if stride != 1 or in_planes != planes:
        sc = dense_pool_ref(x)
        sc = conv(sc, p['w_group'], 1, 0, groups=in_planes, bias=p['b_group'])
        sc = conv(sc, p['w_agg'], 1, 0, bias=p['b_agg'])
        sc = bn(sc, p['bn_sc'])
    else:
        sc = x
    return jax.nn.relu(out + sc)


# -------------------------------------------------------------------- main ---
if __name__ == "__main__":
    fwd = jax.jit(basic_block_forward, static_argnums=(2, 3, 4))
    configs = [
        (2, 4, 8, 16, 16, 2),   # downsampling block with AA_Group shortcut
        (2, 8, 8, 8, 8, 1),     # identity-shortcut block
    ]
    key = jax.random.PRNGKey(0)
    for (B, in_planes, planes, H, W, stride) in configs:
        key, kx, kp = jax.random.split(key, 3)
        x = jax.random.normal(kx, (B, in_planes, H, W), dtype=jnp.float32)
        params = init_params(kp, in_planes, planes)

        out = jax.block_until_ready(fwd(x, params, in_planes, planes, stride))
        ref = jax.block_until_ready(
            basic_block_reference(x, params, in_planes, planes, stride))

        assert out.shape == (B, planes, H // stride, W // stride), out.shape
        # bf16 MXU operands (f32 accumulation) vs. an f32 reference: 2e-2 tolerance.
        if not np.allclose(np.asarray(out), np.asarray(ref), atol=2e-2, rtol=2e-2):
            err = float(np.max(np.abs(np.asarray(out) - np.asarray(ref))))
            raise AssertionError(f"Pallas result mismatch (max abs err {err})")
    print("KERNEL_OK")
</pallas_src>

<mosaic_0001>
module attributes {stable_mosaic.version = 11 : i64} {
  func.func @kernel(%arg0: i32, %arg1: i32, %arg2: memref<128x128xbf16, #tpu.memory_space<vmem>>, %arg3: memref<128x128xbf16, #tpu.memory_space<vmem>>, %arg4: memref<1x128xf32, #tpu.memory_space<vmem>>, %arg5: memref<128x128xbf16, #tpu.memory_space<vmem>>) attributes {dimension_semantics = [#tpu.dimension_semantics<parallel>, #tpu.dimension_semantics<parallel>], iteration_bounds = array<i64: 1, 1>, scalar_prefetch = 0 : i64, scratch_operands = 0 : i64, tpu.core_type = #tpu.core_type<tc>, window_params = [{transform_indices = @transform_0, window_bounds = array<i64: 128, 128>}, {transform_indices = @transform_1, window_bounds = array<i64: 128, 128>}, {transform_indices = @transform_2, window_bounds = array<i64: 1, 128>}, {transform_indices = @transform_3, window_bounds = array<i64: 128, 128>}]} {
    %c0 = arith.constant 0 : index
    %c0_0 = arith.constant 0 : index
    %0 = vector.load %arg2[%c0, %c0_0] : memref<128x128xbf16, #tpu.memory_space<vmem>>, vector<128x128xbf16>
    %c0_1 = arith.constant 0 : index
    %c0_2 = arith.constant 0 : index
    %1 = vector.load %arg3[%c0_1, %c0_2] : memref<128x128xbf16, #tpu.memory_space<vmem>>, vector<128x128xbf16>
    %cst = arith.constant dense<0.000000e+00> : vector<128x128xf32>
    %2 = tpu.matmul %0, %1, %cst {dimension_numbers = #tpu.dot_dimension_numbers<[1], [0], [0], [1], [0, 0, 1, 1], [], []>} : vector<128x128xbf16>, vector<128x128xbf16>, vector<128x128xf32> -> vector<128x128xf32>
    %c0_3 = arith.constant 0 : index
    %c0_4 = arith.constant 0 : index
    %3 = vector.load %arg4[%c0_3, %c0_4] : memref<1x128xf32, #tpu.memory_space<vmem>>, vector<1x128xf32>
    %4 = vector.broadcast %3 : vector<1x128xf32> to vector<128x128xf32>
    %5 = arith.addf %2, %4 : vector<128x128xf32>
    %cst_5 = arith.constant 0.000000e+00 : f32
    %6 = vector.broadcast %cst_5 : f32 to vector<128x128xf32>
    %7 = arith.maximumf %5, %6 : vector<128x128xf32>
    %8 = arith.truncf %7 : vector<128x128xf32> to vector<128x128xbf16>
    %c0_6 = arith.constant 0 : index
    %c0_7 = arith.constant 0 : index
    %9 = vector.load %arg5[%c0_6, %c0_7] : memref<128x128xbf16, #tpu.memory_space<vmem>>, vector<128x128xbf16>
    tpu.vector_store %arg5[%c0_6, %c0_7], %8 {strides = array<i32>} : memref<128x128xbf16, #tpu.memory_space<vmem>>, vector<128x128xbf16>,
    return
  }
  func.func @transform_0(%arg0: i32, %arg1: i32) -> (i32, i32) {
    %c0_i32 = arith.constant 0 : i32
    %c0_i32_0 = arith.constant 0 : i32
    return %arg0, %c0_i32 : i32, i32
  }
  func.func @transform_1(%arg0: i32, %arg1: i32) -> (i32, i32) {
    %c0_i32 = arith.constant 0 : i32
    %c0_i32_0 = arith.constant 0 : i32
    return %c0_i32, %arg1 : i32, i32
  }
  func.func @transform_2(%arg0: i32, %arg1: i32) -> (i32, i32) {
    %c0_i32 = arith.constant 0 : i32
    %c0_i32_0 = arith.constant 0 : i32
    return %c0_i32, %arg1 : i32, i32
  }
  func.func @transform_3(%arg0: i32, %arg1: i32) -> (i32, i32) {
    %c0_i32 = arith.constant 0 : i32
    return %arg0, %arg1 : i32, i32
  }
}

module attributes {stable_mosaic.version = 11 : i64} {
  func.func @kernel(%arg0: i32, %arg1: i32, %arg2: memref<128x128xbf16, #tpu.memory_space<vmem>>, %arg3: memref<128x128xbf16, #tpu.memory_space<vmem>>, %arg4: memref<1x128xf32, #tpu.memory_space<vmem>>, %arg5: memref<128x128xf32, #tpu.memory_space<vmem>>) attributes {dimension_semantics = [#tpu.dimension_semantics<parallel>, #tpu.dimension_semantics<parallel>], iteration_bounds = array<i64: 1, 1>, scalar_prefetch = 0 : i64, scratch_operands = 0 : i64, tpu.core_type = #tpu.core_type<tc>, window_params = [{transform_indices = @transform_0, window_bounds = array<i64: 128, 128>}, {transform_indices = @transform_1, window_bounds = array<i64: 128, 128>}, {transform_indices = @transform_2, window_bounds = array<i64: 1, 128>}, {transform_indices = @transform_3, window_bounds = array<i64: 128, 128>}]} {
    %c0 = arith.constant 0 : index
    %c0_0 = arith.constant 0 : index
    %0 = vector.load %arg2[%c0, %c0_0] : memref<128x128xbf16, #tpu.memory_space<vmem>>, vector<128x128xbf16>
    %c0_1 = arith.constant 0 : index
    %c0_2 = arith.constant 0 : index
    %1 = vector.load %arg3[%c0_1, %c0_2] : memref<128x128xbf16, #tpu.memory_space<vmem>>, vector<128x128xbf16>
    %cst = arith.constant dense<0.000000e+00> : vector<128x128xf32>
    %2 = tpu.matmul %0, %1, %cst {dimension_numbers = #tpu.dot_dimension_numbers<[1], [0], [0], [1], [0, 0, 1, 1], [], []>} : vector<128x128xbf16>, vector<128x128xbf16>, vector<128x128xf32> -> vector<128x128xf32>
    %c0_3 = arith.constant 0 : index
    %c0_4 = arith.constant 0 : index
    %3 = vector.load %arg4[%c0_3, %c0_4] : memref<1x128xf32, #tpu.memory_space<vmem>>, vector<1x128xf32>
    %4 = vector.broadcast %3 : vector<1x128xf32> to vector<128x128xf32>
    %5 = arith.addf %2, %4 : vector<128x128xf32>
    %c0_5 = arith.constant 0 : index
    %c0_6 = arith.constant 0 : index
    %6 = vector.load %arg5[%c0_5, %c0_6] : memref<128x128xf32, #tpu.memory_space<vmem>>, vector<128x128xf32>
    tpu.vector_store %arg5[%c0_5, %c0_6], %5 {strides = array<i32>} : memref<128x128xf32, #tpu.memory_space<vmem>>, vector<128x128xf32>,
    return
  }
  func.func @transform_0(%arg0: i32, %arg1: i32) -> (i32, i32) {
    %c0_i32 = arith.constant 0 : i32
    %c0_i32_0 = arith.constant 0 : i32
    return %arg0, %c0_i32 : i32, i32
  }
  func.func @transform_1(%arg0: i32, %arg1: i32) -> (i32, i32) {
    %c0_i32 = arith.constant 0 : i32
    %c0_i32_0 = arith.constant 0 : i32
    return %c0_i32, %arg1 : i32, i32
  }
  func.func @transform_2(%arg0: i32, %arg1: i32) -> (i32, i32) {
    %c0_i32 = arith.constant 0 : i32
    %c0_i32_0 = arith.constant 0 : i32
    return %c0_i32, %arg1 : i32, i32
  }
  func.func @transform_3(%arg0: i32, %arg1: i32) -> (i32, i32) {
    %c0_i32 = arith.constant 0 : i32
    return %arg0, %arg1 : i32, i32
  }
}

module attributes {stable_mosaic.version = 11 : i64} {
  func.func @kernel(%arg0: i32, %arg1: i32, %arg2: memref<128x128xbf16, #tpu.memory_space<vmem>>, %arg3: memref<128x128xbf16, #tpu.memory_space<vmem>>, %arg4: memref<1x128xf32, #tpu.memory_space<vmem>>, %arg5: memref<128x128xf32, #tpu.memory_space<vmem>>, %arg6: memref<128x128xf32, #tpu.memory_space<vmem>>) attributes {dimension_semantics = [#tpu.dimension_semantics<parallel>, #tpu.dimension_semantics<parallel>], iteration_bounds = array<i64: 1, 1>, scalar_prefetch = 0 : i64, scratch_operands = 0 : i64, tpu.core_type = #tpu.core_type<tc>, window_params = [{transform_indices = @transform_0, window_bounds = array<i64: 128, 128>}, {transform_indices = @transform_1, window_bounds = array<i64: 128, 128>}, {transform_indices = @transform_2, window_bounds = array<i64: 1, 128>}, {transform_indices = @transform_3, window_bounds = array<i64: 128, 128>}, {transform_indices = @transform_4, window_bounds = array<i64: 128, 128>}]} {
    %c0 = arith.constant 0 : index
    %c0_0 = arith.constant 0 : index
    %0 = vector.load %arg2[%c0, %c0_0] : memref<128x128xbf16, #tpu.memory_space<vmem>>, vector<128x128xbf16>
    %c0_1 = arith.constant 0 : index
    %c0_2 = arith.constant 0 : index
    %1 = vector.load %arg3[%c0_1, %c0_2] : memref<128x128xbf16, #tpu.memory_space<vmem>>, vector<128x128xbf16>
    %cst = arith.constant dense<0.000000e+00> : vector<128x128xf32>
    %2 = tpu.matmul %0, %1, %cst {dimension_numbers = #tpu.dot_dimension_numbers<[1], [0], [0], [1], [0, 0, 1, 1], [], []>} : vector<128x128xbf16>, vector<128x128xbf16>, vector<128x128xf32> -> vector<128x128xf32>
    %c0_3 = arith.constant 0 : index
    %c0_4 = arith.constant 0 : index
    %3 = vector.load %arg4[%c0_3, %c0_4] : memref<1x128xf32, #tpu.memory_space<vmem>>, vector<1x128xf32>
    %4 = vector.broadcast %3 : vector<1x128xf32> to vector<128x128xf32>
    %5 = arith.addf %2, %4 : vector<128x128xf32>
    %c0_5 = arith.constant 0 : index
    %c0_6 = arith.constant 0 : index
    %6 = vector.load %arg5[%c0_5, %c0_6] : memref<128x128xf32, #tpu.memory_space<vmem>>, vector<128x128xf32>
    %7 = arith.addf %5, %6 : vector<128x128xf32>
    %cst_7 = arith.constant 0.000000e+00 : f32
    %8 = vector.broadcast %cst_7 : f32 to vector<128x128xf32>
    %9 = arith.maximumf %7, %8 : vector<128x128xf32>
    %c0_8 = arith.constant 0 : index
    %c0_9 = arith.constant 0 : index
    %10 = vector.load %arg6[%c0_8, %c0_9] : memref<128x128xf32, #tpu.memory_space<vmem>>, vector<128x128xf32>
    tpu.vector_store %arg6[%c0_8, %c0_9], %9 {strides = array<i32>} : memref<128x128xf32, #tpu.memory_space<vmem>>, vector<128x128xf32>,
    return
  }
  func.func @transform_0(%arg0: i32, %arg1: i32) -> (i32, i32) {
    %c0_i32 = arith.constant 0 : i32
    %c0_i32_0 = arith.constant 0 : i32
    return %arg0, %c0_i32 : i32, i32
  }
  func.func @transform_1(%arg0: i32, %arg1: i32) -> (i32, i32) {
    %c0_i32 = arith.constant 0 : i32
    %c0_i32_0 = arith.constant 0 : i32
    return %c0_i32, %arg1 : i32, i32
  }
  func.func @transform_2(%arg0: i32, %arg1: i32) -> (i32, i32) {
    %c0_i32 = arith.constant 0 : i32
    %c0_i32_0 = arith.constant 0 : i32
    return %c0_i32, %arg1 : i32, i32
  }
  func.func @transform_3(%arg0: i32, %arg1: i32) -> (i32, i32) {
    %c0_i32 = arith.constant 0 : i32
    return %arg0, %arg1 : i32, i32
  }
  func.func @transform_4(%arg0: i32, %arg1: i32) -> (i32, i32) {
    %c0_i32 = arith.constant 0 : i32
    return %arg0, %arg1 : i32, i32
  }
}

</mosaic_0001>

<bundles_post_ra>
// kernel: basic_block_forward.3
= control target key start
LH: loop header
LB: loop body
LE: loop exit
PB: predicated region body
PF: predicated region fallthrough
CT: control target
= control target key end

     0   :  { %s618_s1 = inlined_call_operand.vmem [shape: bf16[128,128], index: 1, kind: input, shape index: {}]   ;;  %s619_s0 = inlined_call_operand.vmem [shape: bf16[128,128], index: 0, kind: input, shape index: {}]   ;;  %s620_s2 = inlined_call_operand.vmem [shape: f32[1,128], index: 2, kind: input, shape index: {}]   ;;  %s621_s3 = inlined_call_operand.vmem [shape: bf16[128,128], index: 3, kind: output, shape index: {}]  }
   0x1   :  { %v507_v0 = vld [vmem:[%s618_s1 + $0x38] sm:$0xff]   ;;  %v508_v1 = vld [vmem:[%s618_s1 + $0x30] sm:$0xff]   ;;  %v509_v2 = vld [vmem:[%s618_s1 + $0x28] sm:$0xff]  }
   0x2   :  { %459 = vmatprep.subr.bf16.mxu0 %v507_v0  ;;  %491 = vmatprep.subr.bf16.mxu1 %v507_v0  ;;  %v510_v3 = vld [vmem:[%s618_s1 + $0x20] sm:$0xff]   ;;  %v511_v6 = vld [vmem:[%s618_s1 + $0x18] sm:$0xff]   ;;  %v512_v7 = vld [vmem:[%s618_s1 + $0x10] sm:$0xff]  }
   0x3   :  { %460 = vmatpush3.bf16.msra.mxu0 %v507_v0  ;;  %499 = vmatpush3.bf16.msra.mxu1 %v507_v0  ;;  %v515_v4 = vld [vmem:[%s619_s0] sm:$0xff]   ;;  %v513_v8 = vld [vmem:[%s618_s1 + $0x8] sm:$0xff]   ;;  %v519_v12 = vld [vmem:[%s619_s0 + $0x10] sm:$0xff]  }
   0x4   :  { %461 = vmatprep.subr.bf16.mxu0 %v508_v1  ;;  %492 = vmatprep.subr.bf16.mxu1 %v508_v1  ;;  %v516_v5 = vld [vmem:[%s619_s0 + $0x20] sm:$0xff]   ;;  %v517_v10 = vld [vmem:[%s619_s0 + $0x8] sm:$0xff]   ;;  %v520_v13 = vld [vmem:[%s619_s0 + $0x30] sm:$0xff]  }
   0x5   :  { %475 = vmatprep.mubr.bf16.mxu0 %v515_v4  ;;  %483 = vmatprep.mubr.bf16.mxu1 %v516_v5  ;;  %v514_v9 = vld [vmem:[%s618_s1] sm:$0xff]   ;;  %v518_v11 = vld [vmem:[%s619_s0 + $0x28] sm:$0xff]   ;;  %v521_v14 = vld [vmem:[%s619_s0 + $0x18] sm:$0xff]  }
   0x6   :  { %v522_v15 = vld [vmem:[%s619_s0 + $0x38] sm:$0xff]   ;;  %v347_v16 = vld [vmem:[%s620_s2] ss:$0 sm:$0xff] }
   0x7   :  { %462 = vmatpush3.bf16.msra.mxu0 %v508_v1  ;;  %500 = vmatpush3.bf16.msra.mxu1 %v508_v1 }
   0x8   :  { %463 = vmatprep.subr.bf16.mxu0 %v509_v2  ;;  %493 = vmatprep.subr.bf16.mxu1 %v509_v2 }
   0xb   :  { %464 = vmatpush3.bf16.msra.mxu0 %v509_v2  ;;  %501 = vmatpush3.bf16.msra.mxu1 %v509_v2 }
   0xc   :  { %465 = vmatprep.subr.bf16.mxu0 %v510_v3  ;;  %494 = vmatprep.subr.bf16.mxu1 %v510_v3 }
   0xf   :  { %466 = vmatpush3.bf16.msra.mxu0 %v510_v3  ;;  %502 = vmatpush3.bf16.msra.mxu1 %v510_v3 }
  0x10   :  { %467 = vmatprep.subr.bf16.mxu0 %v511_v6  ;;  %495 = vmatprep.subr.bf16.mxu1 %v511_v6 }
  0x13   :  { %468 = vmatpush3.bf16.msra.mxu0 %v511_v6  ;;  %503 = vmatpush3.bf16.msra.mxu1 %v511_v6 }
  0x14   :  { %469 = vmatprep.subr.bf16.mxu0 %v512_v7  ;;  %496 = vmatprep.subr.bf16.mxu1 %v512_v7 }
  0x17   :  { %470 = vmatpush3.bf16.msra.mxu0 %v512_v7  ;;  %504 = vmatpush3.bf16.msra.mxu1 %v512_v7 }
  0x18   :  { %471 = vmatprep.subr.bf16.mxu0 %v513_v8  ;;  %497 = vmatprep.subr.bf16.mxu1 %v513_v8 }
  0x1b   :  { %472 = vmatpush3.bf16.msra.mxu0 %v513_v8  ;;  %505 = vmatpush3.bf16.msra.mxu1 %v513_v8 }
  0x1c   :  { %473 = vmatprep.subr.bf16.mxu0 %v514_v9  ;;  %498 = vmatprep.subr.bf16.mxu1 %v514_v9 }
  0x1f   :  { %474 = vmatpush3.bf16.msra.mxu0 %v514_v9  ;;  %506 = vmatpush3.bf16.msra.mxu1 %v514_v9 }
  0x22   :  { %476 = vmatmul.mubr.bf16.vlgmr.msra.gmra.mxu0 %v517_v10  ;;  %484 = vmatmul.mubr.bf16.vlgmr.msra.gmra.mxu1 %v518_v11 }
  0x23   :  { %479 = vmatprep.mubr.bf16.mxu0 %v519_v12  ;;  %487 = vmatprep.mubr.bf16.mxu1 %v520_v13 }
  0x2a   :  { %480 = vmatmul.mubr.bf16.gmra.mxu0 %v521_v14  ;;  %488 = vmatmul.mubr.bf16.gmra.mxu1 %v522_v15 }
  0xe2   :  { %v477_v17 = vpop.f32.mrf.mxu0  ;;  %v485_v18 = vpop.f32.mrf.mxu1 }
  0xe3   :  { %v193_v19 = vadd.f32 %v477_v17, %v347_v16  ;;  %v225_v20 = vadd.f32 %v485_v18, %v347_v16 }
  0xe4   :  { %v184_v21 = vpop.f32.mrf.mxu0  ;;  %v216_v22 = vpop.f32.mrf.mxu1 }
  0xe5   :  { %v185_v23 = vadd.f32 %v347_v16, %v184_v21  ;;  %v217_v24 = vadd.f32 %v347_v16, %v216_v22  ;;  %v249_v29 = vmax.f32 %v193_v19, 0.0  ;;  %v257_v30 = vmax.f32 %v225_v20, 0.0 }
  0xe6   :  { %v478_v25 = vpop.f32.mrf.mxu0  ;;  %v486_v26 = vpop.f32.mrf.mxu1 }
  0xe7   :  { %v196_v27 = vadd.f32 %v478_v25, %v347_v16  ;;  %v228_v28 = vadd.f32 %v486_v26, %v347_v16  ;;  %v247_v37 = vmax.f32 %v185_v23, 0.0  ;;  %v255_v38 = vmax.f32 %v217_v24, 0.0 }
  0xe8   :  { %v187_v31 = vpop.f32.mrf.mxu0  ;;  %v219_v32 = vpop.f32.mrf.mxu1 }
  0xe9   :  { %v250_v33 = vmax.f32 %v196_v27, 0.0  ;;  %v258_v34 = vmax.f32 %v228_v28, 0.0  ;;  %v188_v35 = vadd.f32 %v347_v16, %v187_v31  ;;  %v220_v36 = vadd.f32 %v347_v16, %v219_v32 }
  0xea   :  { %v481_v39 = vpop.f32.mrf.mxu0  ;;  %v489_v40 = vpop.f32.mrf.mxu1 }
  0xeb   :  { %v404_v41 = vpack.c.bf16 %v250_v33, %v249_v29  ;;  %v424_v42 = vpack.c.bf16 %v258_v34, %v257_v30  ;;  %v248_v43 = vmax.f32 %v188_v35, 0.0  ;;  %v256_v44 = vmax.f32 %v220_v36, 0.0 }
  0xec   :  { %v209_v45 = vadd.f32 %v481_v39, %v347_v16  ;;  %v241_v46 = vadd.f32 %v489_v40, %v347_v16  ;;  %v200_v47 = vpop.f32.mrf.mxu0  ;;  %v232_v48 = vpop.f32.mrf.mxu1 }
  0xed   :  { %436 = vst [vmem:[%s621_s3 + $0x8] sm:$0xff] %v404_v41   ;;  %440 = vst [vmem:[%s621_s3 + $0x28] sm:$0xff] %v424_v42   ;;  %v399_v49 = vpack.c.bf16 %v248_v43, %v247_v37  ;;  %v419_v50 = vpack.c.bf16 %v256_v44, %v255_v38  ;;  %v201_v51 = vadd.f32 %v347_v16, %v200_v47 }
  0xee   :  { %v233_v52 = vadd.f32 %v347_v16, %v232_v48  ;;  %v482_v53 = vpop.f32.mrf.mxu0  ;;  %v490_v54 = vpop.f32.mrf.mxu1  ;;  %v253_v57 = vmax.f32 %v209_v45, 0.0  ;;  %v261_v58 = vmax.f32 %v241_v46, 0.0 }
  0xef   :  { %400 = vst [vmem:[%s621_s3] sm:$0xff] %v399_v49   ;;  %439 = vst [vmem:[%s621_s3 + $0x20] sm:$0xff] %v419_v50   ;;  %v212_v55 = vadd.f32 %v482_v53, %v347_v16  ;;  %v244_v56 = vadd.f32 %v490_v54, %v347_v16  ;;  %v251_v1 = vmax.f32 %v201_v51, 0.0 }
  0xf0   :  { %v203_v59 = vpop.f32.mrf.mxu0  ;;  %v235_v60 = vpop.f32.mrf.mxu1  ;;  %v259_v2 = vmax.f32 %v233_v52, 0.0 }
  0xf1   :  { %v254_v61 = vmax.f32 %v212_v55, 0.0  ;;  %v262_v62 = vmax.f32 %v244_v56, 0.0  ;;  %v204_v63 = vadd.f32 %v347_v16, %v203_v59  ;;  %v236_v0 = vadd.f32 %v347_v16, %v235_v60 }
  0xf3   :  { %v414_v3 = vpack.c.bf16 %v254_v61, %v253_v57  ;;  %v434_v4 = vpack.c.bf16 %v262_v62, %v261_v58  ;;  %v252_v5 = vmax.f32 %v204_v63, 0.0  ;;  %v260_v6 = vmax.f32 %v236_v0, 0.0 }
  0xf5   :  { %438 = vst [vmem:[%s621_s3 + $0x18] sm:$0xff] %v414_v3   ;;  %442 = vst [vmem:[%s621_s3 + $0x38] sm:$0xff] %v434_v4   ;;  %v409_v7 = vpack.c.bf16 %v252_v5, %v251_v1  ;;  %v429_v8 = vpack.c.bf16 %v260_v6, %v259_v2 }
  0xf7   :  { %437 = vst [vmem:[%s621_s3 + $0x10] sm:$0xff] %v409_v7   ;;  %441 = vst [vmem:[%s621_s3 + $0x30] sm:$0xff] %v429_v8  }

// kernel: basic_block_forward.4
= control target key start
LH: loop header
LB: loop body
LE: loop exit
PB: predicated region body
PF: predicated region fallthrough
CT: control target
= control target key end

     0   :  { %s483_s1 = inlined_call_operand.vmem [shape: bf16[128,128], index: 1, kind: input, shape index: {}]   ;;  %s484_s0 = inlined_call_operand.vmem [shape: bf16[128,128], index: 0, kind: input, shape index: {}]   ;;  %s485_s2 = inlined_call_operand.vmem [shape: f32[1,128], index: 2, kind: input, shape index: {}]   ;;  %s486_s3 = inlined_call_operand.vmem [shape: f32[128,128], index: 3, kind: output, shape index: {}]  }
   0x1   :  { %v348_v0 = vld [vmem:[%s483_s1 + $0x38] sm:$0xff]   ;;  %v349_v1 = vld [vmem:[%s483_s1 + $0x30] sm:$0xff]   ;;  %v350_v2 = vld [vmem:[%s483_s1 + $0x28] sm:$0xff]  }
   0x2   :  { %300 = vmatprep.subr.bf16.mxu0 %v348_v0  ;;  %332 = vmatprep.subr.bf16.mxu1 %v348_v0  ;;  %v351_v3 = vld [vmem:[%s483_s1 + $0x20] sm:$0xff]   ;;  %v352_v6 = vld [vmem:[%s483_s1 + $0x18] sm:$0xff]   ;;  %v353_v7 = vld [vmem:[%s483_s1 + $0x10] sm:$0xff]  }
   0x3   :  { %301 = vmatpush3.bf16.msra.mxu0 %v348_v0  ;;  %340 = vmatpush3.bf16.msra.mxu1 %v348_v0  ;;  %v356_v4 = vld [vmem:[%s484_s0] sm:$0xff]   ;;  %v354_v8 = vld [vmem:[%s483_s1 + $0x8] sm:$0xff]   ;;  %v360_v12 = vld [vmem:[%s484_s0 + $0x10] sm:$0xff]  }
   0x4   :  { %302 = vmatprep.subr.bf16.mxu0 %v349_v1  ;;  %333 = vmatprep.subr.bf16.mxu1 %v349_v1  ;;  %v357_v5 = vld [vmem:[%s484_s0 + $0x20] sm:$0xff]   ;;  %v358_v10 = vld [vmem:[%s484_s0 + $0x8] sm:$0xff]   ;;  %v361_v13 = vld [vmem:[%s484_s0 + $0x30] sm:$0xff]  }
   0x5   :  { %316 = vmatprep.mubr.bf16.mxu0 %v356_v4  ;;  %324 = vmatprep.mubr.bf16.mxu1 %v357_v5  ;;  %v355_v9 = vld [vmem:[%s483_s1] sm:$0xff]   ;;  %v359_v11 = vld [vmem:[%s484_s0 + $0x28] sm:$0xff]   ;;  %v362_v14 = vld [vmem:[%s484_s0 + $0x18] sm:$0xff]  }
   0x6   :  { %v363_v15 = vld [vmem:[%s484_s0 + $0x38] sm:$0xff]   ;;  %v267_v16 = vld [vmem:[%s485_s2] ss:$0 sm:$0xff] }
   0x7   :  { %303 = vmatpush3.bf16.msra.mxu0 %v349_v1  ;;  %341 = vmatpush3.bf16.msra.mxu1 %v349_v1 }
   0x8   :  { %304 = vmatprep.subr.bf16.mxu0 %v350_v2  ;;  %334 = vmatprep.subr.bf16.mxu1 %v350_v2 }
   0xb   :  { %305 = vmatpush3.bf16.msra.mxu0 %v350_v2  ;;  %342 = vmatpush3.bf16.msra.mxu1 %v350_v2 }
   0xc   :  { %306 = vmatprep.subr.bf16.mxu0 %v351_v3  ;;  %335 = vmatprep.subr.bf16.mxu1 %v351_v3 }
   0xf   :  { %307 = vmatpush3.bf16.msra.mxu0 %v351_v3  ;;  %343 = vmatpush3.bf16.msra.mxu1 %v351_v3 }
  0x10   :  { %308 = vmatprep.subr.bf16.mxu0 %v352_v6  ;;  %336 = vmatprep.subr.bf16.mxu1 %v352_v6 }
  0x13   :  { %309 = vmatpush3.bf16.msra.mxu0 %v352_v6  ;;  %344 = vmatpush3.bf16.msra.mxu1 %v352_v6 }
  0x14   :  { %310 = vmatprep.subr.bf16.mxu0 %v353_v7  ;;  %337 = vmatprep.subr.bf16.mxu1 %v353_v7 }
  0x17   :  { %311 = vmatpush3.bf16.msra.mxu0 %v353_v7  ;;  %345 = vmatpush3.bf16.msra.mxu1 %v353_v7 }
  0x18   :  { %312 = vmatprep.subr.bf16.mxu0 %v354_v8  ;;  %338 = vmatprep.subr.bf16.mxu1 %v354_v8 }
  0x1b   :  { %313 = vmatpush3.bf16.msra.mxu0 %v354_v8  ;;  %346 = vmatpush3.bf16.msra.mxu1 %v354_v8 }
  0x1c   :  { %314 = vmatprep.subr.bf16.mxu0 %v355_v9  ;;  %339 = vmatprep.subr.bf16.mxu1 %v355_v9 }
  0x1f   :  { %315 = vmatpush3.bf16.msra.mxu0 %v355_v9  ;;  %347 = vmatpush3.bf16.msra.mxu1 %v355_v9 }
  0x22   :  { %317 = vmatmul.mubr.bf16.vlgmr.msra.gmra.mxu0 %v358_v10  ;;  %325 = vmatmul.mubr.bf16.vlgmr.msra.gmra.mxu1 %v359_v11 }
  0x23   :  { %320 = vmatprep.mubr.bf16.mxu0 %v360_v12  ;;  %328 = vmatprep.mubr.bf16.mxu1 %v361_v13 }
  0x2a   :  { %321 = vmatmul.mubr.bf16.gmra.mxu0 %v362_v14  ;;  %329 = vmatmul.mubr.bf16.gmra.mxu1 %v363_v15 }
  0xe2   :  { %v318_v17 = vpop.f32.mrf.mxu0  ;;  %v326_v18 = vpop.f32.mrf.mxu1 }
  0xe3   :  { %v193_v19 = vadd.f32 %v318_v17, %v267_v16  ;;  %v225_v20 = vadd.f32 %v326_v18, %v267_v16 }
  0xe4   :  { %v184_v21 = vpop.f32.mrf.mxu0  ;;  %v216_v22 = vpop.f32.mrf.mxu1 }
  0xe5   :  { %249 = vst [vmem:[%s486_s3 + $0x10] sm:$0xff] %v193_v19  ;;  %257 = vst [vmem:[%s486_s3 + $0x50] sm:$0xff] %v225_v20  ;;  %v185_v23 = vadd.f32 %v267_v16, %v184_v21  ;;  %v217_v24 = vadd.f32 %v267_v16, %v216_v22 }
  0xe6   :  { %v319_v25 = vpop.f32.mrf.mxu0  ;;  %v327_v26 = vpop.f32.mrf.mxu1 }
  0xe7   :  { %247 = vst [vmem:[%s486_s3] sm:$0xff] %v185_v23  ;;  %255 = vst [vmem:[%s486_s3 + $0x40] sm:$0xff] %v217_v24  ;;  %v196_v27 = vadd.f32 %v319_v25, %v267_v16  ;;  %v228_v28 = vadd.f32 %v327_v26, %v267_v16 }
  0xe8   :  { %v187_v29 = vpop.f32.mrf.mxu0  ;;  %v219_v30 = vpop.f32.mrf.mxu1 }
  0xe9   :  { %250 = vst [vmem:[%s486_s3 + $0x18] sm:$0xff] %v196_v27  ;;  %258 = vst [vmem:[%s486_s3 + $0x58] sm:$0xff] %v228_v28  ;;  %v188_v31 = vadd.f32 %v267_v16, %v187_v29  ;;  %v220_v32 = vadd.f32 %v267_v16, %v219_v30 }
  0xea   :  { %v322_v33 = vpop.f32.mrf.mxu0  ;;  %v330_v34 = vpop.f32.mrf.mxu1 }
  0xeb   :  { %248 = vst [vmem:[%s486_s3 + $0x8] sm:$0xff] %v188_v31  ;;  %256 = vst [vmem:[%s486_s3 + $0x48] sm:$0xff] %v220_v32  ;;  %v209_v35 = vadd.f32 %v322_v33, %v267_v16  ;;  %v241_v36 = vadd.f32 %v330_v34, %v267_v16 }
  0xec   :  { %v200_v37 = vpop.f32.mrf.mxu0  ;;  %v232_v38 = vpop.f32.mrf.mxu1 }
  0xed   :  { %253 = vst [vmem:[%s486_s3 + $0x30] sm:$0xff] %v209_v35  ;;  %261 = vst [vmem:[%s486_s3 + $0x70] sm:$0xff] %v241_v36  ;;  %v201_v39 = vadd.f32 %v267_v16, %v200_v37  ;;  %v233_v40 = vadd.f32 %v267_v16, %v232_v38 }
  0xee   :  { %v323_v41 = vpop.f32.mrf.mxu0  ;;  %v331_v42 = vpop.f32.mrf.mxu1 }
  0xef   :  { %251 = vst [vmem:[%s486_s3 + $0x20] sm:$0xff] %v201_v39  ;;  %259 = vst [vmem:[%s486_s3 + $0x60] sm:$0xff] %v233_v40  ;;  %v212_v43 = vadd.f32 %v323_v41, %v267_v16  ;;  %v244_v44 = vadd.f32 %v331_v42, %v267_v16 }
  0xf0   :  { %v203_v45 = vpop.f32.mrf.mxu0  ;;  %v235_v46 = vpop.f32.mrf.mxu1 }
  0xf1   :  { %254 = vst [vmem:[%s486_s3 + $0x38] sm:$0xff] %v212_v43  ;;  %262 = vst [vmem:[%s486_s3 + $0x78] sm:$0xff] %v244_v44  ;;  %v204_v47 = vadd.f32 %v267_v16, %v203_v45  ;;  %v236_v48 = vadd.f32 %v267_v16, %v235_v46 }
  0xf3   :  { %252 = vst [vmem:[%s486_s3 + $0x28] sm:$0xff] %v204_v47  ;;  %260 = vst [vmem:[%s486_s3 + $0x68] sm:$0xff] %v236_v48 }

// kernel: basic_block_forward.5
= control target key start
LH: loop header
LB: loop body
LE: loop exit
PB: predicated region body
PF: predicated region fallthrough
CT: control target
= control target key end

     0   :  { %s605_s1 = inlined_call_operand.vmem [shape: bf16[128,128], index: 1, kind: input, shape index: {}]   ;;  %s606_s0 = inlined_call_operand.vmem [shape: bf16[128,128], index: 0, kind: input, shape index: {}]   ;;  %s607_s2 = inlined_call_operand.vmem [shape: f32[1,128], index: 2, kind: input, shape index: {}]   ;;  %s608_s3 = inlined_call_operand.vmem [shape: f32[128,128], index: 3, kind: input, shape index: {}]   ;;  %s609_s4 = inlined_call_operand.vmem [shape: f32[128,128], index: 4, kind: output, shape index: {}]  }
   0x1   :  { %v399_v0 = vld [vmem:[%s605_s1 + $0x38] sm:$0xff]   ;;  %v400_v1 = vld [vmem:[%s605_s1 + $0x30] sm:$0xff]   ;;  %v401_v2 = vld [vmem:[%s605_s1 + $0x28] sm:$0xff]  }
   0x2   :  { %351 = vmatprep.subr.bf16.mxu0 %v399_v0  ;;  %383 = vmatprep.subr.bf16.mxu1 %v399_v0  ;;  %v402_v3 = vld [vmem:[%s605_s1 + $0x20] sm:$0xff]   ;;  %v403_v6 = vld [vmem:[%s605_s1 + $0x18] sm:$0xff]   ;;  %v404_v7 = vld [vmem:[%s605_s1 + $0x10] sm:$0xff]  }
   0x3   :  { %352 = vmatpush3.bf16.msra.mxu0 %v399_v0  ;;  %391 = vmatpush3.bf16.msra.mxu1 %v399_v0  ;;  %v407_v4 = vld [vmem:[%s606_s0] sm:$0xff]   ;;  %v405_v8 = vld [vmem:[%s605_s1 + $0x8] sm:$0xff]   ;;  %v411_v12 = vld [vmem:[%s606_s0 + $0x10] sm:$0xff]  }
   0x4   :  { %353 = vmatprep.subr.bf16.mxu0 %v400_v1  ;;  %384 = vmatprep.subr.bf16.mxu1 %v400_v1  ;;  %v408_v5 = vld [vmem:[%s606_s0 + $0x20] sm:$0xff]   ;;  %v409_v10 = vld [vmem:[%s606_s0 + $0x8] sm:$0xff]   ;;  %v412_v13 = vld [vmem:[%s606_s0 + $0x30] sm:$0xff]  }
   0x5   :  { %367 = vmatprep.mubr.bf16.mxu0 %v407_v4  ;;  %375 = vmatprep.mubr.bf16.mxu1 %v408_v5  ;;  %v406_v9 = vld [vmem:[%s605_s1] sm:$0xff]   ;;  %v410_v11 = vld [vmem:[%s606_s0 + $0x28] sm:$0xff]   ;;  %v413_v14 = vld [vmem:[%s606_s0 + $0x18] sm:$0xff]  }
   0x6   :  { %v414_v15 = vld [vmem:[%s606_s0 + $0x38] sm:$0xff]   ;;  %v491_v16 = vld [vmem:[%s607_s2] ss:$0 sm:$0xff]  ;;  %v252_v18 = vld [vmem:[%s608_s3 + $0x10] sm:$0xff] }
   0x7   :  { %354 = vmatpush3.bf16.msra.mxu0 %v400_v1  ;;  %392 = vmatpush3.bf16.msra.mxu1 %v400_v1  ;;  %v260_v20 = vld [vmem:[%s608_s3 + $0x50] sm:$0xff]  ;;  %v250_v24 = vld [vmem:[%s608_s3] sm:$0xff]  ;;  %v253_v37 = vld [vmem:[%s608_s3 + $0x18] sm:$0xff] }
   0x8   :  { %355 = vmatprep.subr.bf16.mxu0 %v401_v2  ;;  %385 = vmatprep.subr.bf16.mxu1 %v401_v2  ;;  %v258_v26 = vld [vmem:[%s608_s3 + $0x40] sm:$0xff]  ;;  %v261_v38 = vld [vmem:[%s608_s3 + $0x58] sm:$0xff]  ;;  %v251_v42 = vld [vmem:[%s608_s3 + $0x8] sm:$0xff] }
   0x9   :  { %v259_v44 = vld [vmem:[%s608_s3 + $0x48] sm:$0xff]  ;;  %v256_v52 = vld [vmem:[%s608_s3 + $0x30] sm:$0xff]  ;;  %v262_v4 = vld [vmem:[%s608_s3 + $0x60] sm:$0xff] }
   0xa   :  { %v264_v54 = vld [vmem:[%s608_s3 + $0x70] sm:$0xff] }
   0xb   :  { %356 = vmatpush3.bf16.msra.mxu0 %v401_v2  ;;  %393 = vmatpush3.bf16.msra.mxu1 %v401_v2 }
   0xc   :  { %357 = vmatprep.subr.bf16.mxu0 %v402_v3  ;;  %386 = vmatprep.subr.bf16.mxu1 %v402_v3 }
   0xf   :  { %358 = vmatpush3.bf16.msra.mxu0 %v402_v3  ;;  %394 = vmatpush3.bf16.msra.mxu1 %v402_v3  ;;  %v254_v3 = vld [vmem:[%s608_s3 + $0x20] sm:$0xff] }
  0x10   :  { %359 = vmatprep.subr.bf16.mxu0 %v403_v6  ;;  %387 = vmatprep.subr.bf16.mxu1 %v403_v6 }
  0x13   :  { %360 = vmatpush3.bf16.msra.mxu0 %v403_v6  ;;  %395 = vmatpush3.bf16.msra.mxu1 %v403_v6 }
  0x14   :  { %361 = vmatprep.subr.bf16.mxu0 %v404_v7  ;;  %388 = vmatprep.subr.bf16.mxu1 %v404_v7 }
  0x17   :  { %362 = vmatpush3.bf16.msra.mxu0 %v404_v7  ;;  %396 = vmatpush3.bf16.msra.mxu1 %v404_v7 }
  0x18   :  { %363 = vmatprep.subr.bf16.mxu0 %v405_v8  ;;  %389 = vmatprep.subr.bf16.mxu1 %v405_v8 }
  0x1b   :  { %364 = vmatpush3.bf16.msra.mxu0 %v405_v8  ;;  %397 = vmatpush3.bf16.msra.mxu1 %v405_v8  ;;  %v257_v8 = vld [vmem:[%s608_s3 + $0x38] sm:$0xff] }
  0x1c   :  { %365 = vmatprep.subr.bf16.mxu0 %v406_v9  ;;  %390 = vmatprep.subr.bf16.mxu1 %v406_v9 }
  0x1f   :  { %366 = vmatpush3.bf16.msra.mxu0 %v406_v9  ;;  %398 = vmatpush3.bf16.msra.mxu1 %v406_v9 }
  0x22   :  { %368 = vmatmul.mubr.bf16.vlgmr.msra.gmra.mxu0 %v409_v10  ;;  %376 = vmatmul.mubr.bf16.vlgmr.msra.gmra.mxu1 %v410_v11  ;;  %v265_v10 = vld [vmem:[%s608_s3 + $0x78] sm:$0xff] }
  0x23   :  { %371 = vmatprep.mubr.bf16.mxu0 %v411_v12  ;;  %379 = vmatprep.mubr.bf16.mxu1 %v412_v13 }
  0x2a   :  { %372 = vmatmul.mubr.bf16.gmra.mxu0 %v413_v14  ;;  %380 = vmatmul.mubr.bf16.gmra.mxu1 %v414_v15 }
  0xe2   :  { %v369_v17 = vpop.f32.mrf.mxu0  ;;  %v377_v19 = vpop.f32.mrf.mxu1 }
  0xe3   :  { %v196_v21 = vadd.f32 %v369_v17, %v491_v16  ;;  %v228_v22 = vadd.f32 %v377_v19, %v491_v16  ;;  %v255_v19 = vld [vmem:[%s608_s3 + $0x28] sm:$0xff] }
  0xe4   :  { %v187_v23 = vpop.f32.mrf.mxu0  ;;  %v219_v25 = vpop.f32.mrf.mxu1 }
  0xe5   :  { %v268_v27 = vadd.f32 %v252_v18, %v196_v21  ;;  %v276_v28 = vadd.f32 %v260_v20, %v228_v22  ;;  %v188_v29 = vadd.f32 %v491_v16, %v187_v23  ;;  %v220_v30 = vadd.f32 %v491_v16, %v219_v25  ;;  %v263_v21 = vld [vmem:[%s608_s3 + $0x68] sm:$0xff] }
  0xe6   :  { %v370_v31 = vpop.f32.mrf.mxu0  ;;  %v378_v32 = vpop.f32.mrf.mxu1 }
  0xe7   :  { %v284_v33 = vmax.f32 %v268_v27, 0.0  ;;  %v292_v34 = vmax.f32 %v276_v28, 0.0  ;;  %v266_v35 = vadd.f32 %v250_v24, %v188_v29  ;;  %v274_v36 = vadd.f32 %v258_v26, %v220_v30 }
  0xe8   :  { %v199_v39 = vadd.f32 %v370_v31, %v491_v16  ;;  %v231_v40 = vadd.f32 %v378_v32, %v491_v16  ;;  %v190_v41 = vpop.f32.mrf.mxu0  ;;  %v222_v43 = vpop.f32.mrf.mxu1 }
  0xe9   :  { %300 = vst [vmem:[%s609_s4 + $0x10] sm:$0xff] %v284_v33  ;;  %308 = vst [vmem:[%s609_s4 + $0x50] sm:$0xff] %v292_v34  ;;  %v282_v45 = vmax.f32 %v266_v35, 0.0  ;;  %v290_v46 = vmax.f32 %v274_v36, 0.0  ;;  %v191_v47 = vadd.f32 %v491_v16, %v190_v41  ;;  %v223_v48 = vadd.f32 %v491_v16, %v222_v43 }
  0xea   :  { %v269_v49 = vadd.f32 %v253_v37, %v199_v39  ;;  %v277_v50 = vadd.f32 %v261_v38, %v231_v40  ;;  %v373_v51 = vpop.f32.mrf.mxu0  ;;  %v381_v53 = vpop.f32.mrf.mxu1 }
  0xeb   :  { %298 = vst [vmem:[%s609_s4] sm:$0xff] %v282_v45  ;;  %306 = vst [vmem:[%s609_s4 + $0x40] sm:$0xff] %v290_v46  ;;  %v267_v55 = vadd.f32 %v251_v42, %v191_v47  ;;  %v275_v56 = vadd.f32 %v259_v44, %v223_v48  ;;  %v212_v57 = vadd.f32 %v373_v51, %v491_v16 }
  0xec   :  { %v244_v58 = vadd.f32 %v381_v53, %v491_v16  ;;  %v285_v59 = vmax.f32 %v269_v49, 0.0  ;;  %v293_v60 = vmax.f32 %v277_v50, 0.0  ;;  %v203_v61 = vpop.f32.mrf.mxu0  ;;  %v235_v62 = vpop.f32.mrf.mxu1 }
  0xed   :  { %v283_v63 = vmax.f32 %v267_v55, 0.0  ;;  %v291_v0 = vmax.f32 %v275_v56, 0.0  ;;  %v272_v1 = vadd.f32 %v256_v52, %v212_v57  ;;  %v204_v5 = vadd.f32 %v491_v16, %v203_v61 }
  0xee   :  { %v280_v2 = vadd.f32 %v264_v54, %v244_v58  ;;  %301 = vst [vmem:[%s609_s4 + $0x18] sm:$0xff] %v285_v59  ;;  %309 = vst [vmem:[%s609_s4 + $0x58] sm:$0xff] %v293_v60  ;;  %v236_v6 = vadd.f32 %v491_v16, %v235_v62  ;;  %v374_v7 = vpop.f32.mrf.mxu0  ;;  %v382_v9 = vpop.f32.mrf.mxu1 }
  0xef   :  { %299 = vst [vmem:[%s609_s4 + $0x8] sm:$0xff] %v283_v63  ;;  %307 = vst [vmem:[%s609_s4 + $0x48] sm:$0xff] %v291_v0  ;;  %v288_v11 = vmax.f32 %v272_v1, 0.0  ;;  %v215_v13 = vadd.f32 %v374_v7, %v491_v16  ;;  %v247_v14 = vadd.f32 %v382_v9, %v491_v16  ;;  %v270_v15 = vadd.f32 %v254_v3, %v204_v5 }
  0xf0   :  { %v296_v12 = vmax.f32 %v280_v2, 0.0  ;;  %v278_v17 = vadd.f32 %v262_v4, %v236_v6  ;;  %v206_v18 = vpop.f32.mrf.mxu0  ;;  %v238_v20 = vpop.f32.mrf.mxu1 }
  0xf1   :  { %304 = vst [vmem:[%s609_s4 + $0x30] sm:$0xff] %v288_v11  ;;  %v273_v22 = vadd.f32 %v257_v8, %v215_v13  ;;  %v281_v23 = vadd.f32 %v265_v10, %v247_v14  ;;  %v207_v24 = vadd.f32 %v491_v16, %v206_v18  ;;  %v239_v25 = vadd.f32 %v491_v16, %v238_v20 }
  0xf2   :  { %312 = vst [vmem:[%s609_s4 + $0x70] sm:$0xff] %v296_v12  ;;  %v286_v26 = vmax.f32 %v270_v15, 0.0  ;;  %v294_v27 = vmax.f32 %v278_v17, 0.0 }
  0xf3   :  { %v289_v28 = vmax.f32 %v273_v22, 0.0  ;;  %v297_v29 = vmax.f32 %v281_v23, 0.0  ;;  %v271_v30 = vadd.f32 %v255_v19, %v207_v24  ;;  %v279_v31 = vadd.f32 %v263_v21, %v239_v25 }
  0xf4   :  { %302 = vst [vmem:[%s609_s4 + $0x20] sm:$0xff] %v286_v26  ;;  %310 = vst [vmem:[%s609_s4 + $0x60] sm:$0xff] %v294_v27 }
  0xf5   :  { %305 = vst [vmem:[%s609_s4 + $0x38] sm:$0xff] %v289_v28  ;;  %313 = vst [vmem:[%s609_s4 + $0x78] sm:$0xff] %v297_v29  ;;  %v287_v16 = vmax.f32 %v271_v30, 0.0  ;;  %v295_v32 = vmax.f32 %v279_v31, 0.0 }
  0xf7   :  { %303 = vst [vmem:[%s609_s4 + $0x28] sm:$0xff] %v287_v16  ;;  %311 = vst [vmem:[%s609_s4 + $0x68] sm:$0xff] %v295_v32 }

</bundles_post_ra>
